<compile_context>
chip_gen: v7x
topology: tpu7x:2x2x1
jax: 0.10.0
libtpu: 0.0.40
codegen_flags: <defaults>
</compile_context>

<pallas_src>
import math

import jax
import jax.numpy as jnp
from jax.experimental import pallas as pl
from jax.experimental.pallas import tpu as pltpu


def mlp_kernel(x_ref,
               w1_ref, b1_ref,
               w2_ref, b2_ref,
               w3_ref, b3_ref,
               w4_ref, b4_ref,
               o_ref):
    x = x_ref[...]                                    # (block_m, 2)

    # fc1 (K=2): two VPU outer-product FMAs instead of an MXU matmul.
    h = x[:, 0:1] * w1_ref[0:1, :] + x[:, 1:2] * w1_ref[1:2, :]
    h = jnp.maximum(h + b1_ref[...], 0.0)             # (block_m, 32)

    # fc2 + relu (MXU)
    h = jnp.dot(h, w2_ref[...], preferred_element_type=jnp.float32)
    h = jnp.maximum(h + b2_ref[...], 0.0)             # (block_m, 64)

    # fc3 + relu (MXU)
    h = jnp.dot(h, w3_ref[...], preferred_element_type=jnp.float32)
    h = jnp.maximum(h + b3_ref[...], 0.0)             # (block_m, 128)

    # fc4: true (128,1) matvec -> narrow (block_m, 1) store (no column padding).
    y = jnp.dot(h, w4_ref[...], preferred_element_type=jnp.float32)
    o_ref[...] = (y + b4_ref[...]).astype(o_ref.dtype)  # (block_m, 1)


def _round_up(v, m):
    return ((v + m - 1) // m) * m


def net_c_forward(x, params, *, block_m=4096):
    """x: (N, 2) float32. params: (in,out) weights, (1,out) biases (PyTorch-transposed)."""
    N, Din = x.shape
    w1, b1 = params["w1"], params["b1"]
    w2, b2 = params["w2"], params["b2"]
    w3, b3 = params["w3"], params["b3"]
    w4, b4 = params["w4"], params["b4"]

    # Pick the effective batch tile:
    #  * cap at ~ceil(N/2) so there are always >= 2 grid steps (v7x has 2 TCs;
    #    the "parallel" axis is how the grid shards across them),
    #  * never below one 8-row f32 sublane tile,
    #  * always a multiple of 8.
    bm = min(block_m, max(8, _round_up(pl.cdiv(N, 2), 8)))
    assert bm % 8 == 0
    n_blocks = pl.cdiv(N, bm)
    n_pad = n_blocks * bm
    if n_pad != N:
        # Small (<= bm rows x 2 cols) pad; padded rows are sliced off below.
        x = jnp.pad(x, ((0, n_pad - N), (0, 0)))

    def full_block(arr):
        # Constant block index => fetched once, held VMEM-resident across the grid.
        return pl.BlockSpec(arr.shape, lambda i: (0, 0))

    # Scheduler hint for XLA: real flops / bytes of this MLP (narrow output).
    flops = 2 * n_pad * (2 * 32 + 32 * 64 + 64 * 128 + 128 * 1)
    bytes_accessed = (
        n_pad * Din * 4                                   # x
        + n_pad * 1 * 4                                   # (N, 1) output
        + sum(int(a.size) * 4 for a in (w1, b1, w2, b2, w3, b3, w4, b4))
    )

    out_padded = pl.pallas_call(
        mlp_kernel,
        out_shape=jax.ShapeDtypeStruct((n_pad, 1), jnp.float32),
        grid=(n_blocks,),
        in_specs=[
            pl.BlockSpec((bm, Din), lambda i: (i, 0)),    # x batch tile
            full_block(w1), full_block(b1),
            full_block(w2), full_block(b2),
            full_block(w3), full_block(b3),
            full_block(w4), full_block(b4),
        ],
        out_specs=pl.BlockSpec((bm, 1), lambda i: (i, 0)),
        compiler_params=pltpu.CompilerParams(
            dimension_semantics=("parallel",)),
        cost_estimate=pl.CostEstimate(
            flops=flops, transcendentals=0, bytes_accessed=bytes_accessed),
    )(x, w1, b1, w2, b2, w3, b3, w4, b4)

    # Drop batch padding (output is already a single column).
    return out_padded[:N]


def init_params(key):
    """Deterministic init mimicking nn.Linear default (U[-1/sqrt(fan_in), +1/sqrt(fan_in)]).
    Weights stored as (in_features, out_features)."""
    dims = [(2, 32), (32, 64), (64, 128), (128, 1)]
    params = {}
    for idx, (din, dout) in enumerate(dims, start=1):
        key, kw, kb = jax.random.split(key, 3)
        bound = 1.0 / math.sqrt(din)
        params[f"w{idx}"] = jax.random.uniform(
            kw, (din, dout), jnp.float32, minval=-bound, maxval=bound)
        params[f"b{idx}"] = jax.random.uniform(
            kb, (1, dout), jnp.float32, minval=-bound, maxval=bound)
    return params


def net_c_reference(x, params):
    h = jnp.maximum(x @ params["w1"] + params["b1"], 0.0)
    h = jnp.maximum(h @ params["w2"] + params["b2"], 0.0)
    h = jnp.maximum(h @ params["w3"] + params["b3"], 0.0)
    return h @ params["w4"] + params["b4"]


if __name__ == "__main__":
    key = jax.random.PRNGKey(0)
    key, kx, kx2 = jax.random.split(key, 3)
    params = init_params(key)

    # Small batch (tile shrinks to 8 rows, 2 grid steps).
    N = 16
    x = jax.random.normal(kx, (N, 2), dtype=jnp.float32)
    out = jax.block_until_ready(net_c_forward(x, params))
    ref = net_c_reference(x, params)
    assert out.shape == (N, 1), out.shape
    assert jnp.allclose(out, ref, atol=2e-5, rtol=1e-5), "mismatch vs reference (N=16)"

    # Ragged batch: exercises batch padding + multi-block grid.
    N2 = 300
    x2 = jax.random.normal(kx2, (N2, 2), dtype=jnp.float32)
    out2 = jax.block_until_ready(net_c_forward(x2, params))
    ref2 = net_c_reference(x2, params)
    assert out2.shape == (N2, 1), out2.shape
    assert jnp.allclose(out2, ref2, atol=2e-5, rtol=1e-5), "mismatch vs reference (N=300)"

    print("KERNEL_OK")
</pallas_src>

<mosaic_0001>
module attributes {stable_mosaic.version = 11 : i64} {
  func.func @mlp_kernel(%arg0: i32, %arg1: memref<8x2xf32, #tpu.memory_space<vmem>>, %arg2: memref<2x32xf32, #tpu.memory_space<vmem>>, %arg3: memref<1x32xf32, #tpu.memory_space<vmem>>, %arg4: memref<32x64xf32, #tpu.memory_space<vmem>>, %arg5: memref<1x64xf32, #tpu.memory_space<vmem>>, %arg6: memref<64x128xf32, #tpu.memory_space<vmem>>, %arg7: memref<1x128xf32, #tpu.memory_space<vmem>>, %arg8: memref<128x1xf32, #tpu.memory_space<vmem>>, %arg9: memref<1x1xf32, #tpu.memory_space<vmem>>, %arg10: memref<8x1xf32, #tpu.memory_space<vmem>>) attributes {dimension_semantics = [#tpu.dimension_semantics<parallel>], iteration_bounds = array<i64: 2>, scalar_prefetch = 0 : i64, scratch_operands = 0 : i64, tpu.core_type = #tpu.core_type<tc>, window_params = [{transform_indices = @transform_0, window_bounds = array<i64: 8, 2>}, {pipeline_mode = #tpu.pipeline_mode<synchronous>, transform_indices = @transform_1, window_bounds = array<i64: 2, 32>}, {pipeline_mode = #tpu.pipeline_mode<synchronous>, transform_indices = @transform_2, window_bounds = array<i64: 1, 32>}, {pipeline_mode = #tpu.pipeline_mode<synchronous>, transform_indices = @transform_3, window_bounds = array<i64: 32, 64>}, {pipeline_mode = #tpu.pipeline_mode<synchronous>, transform_indices = @transform_4, window_bounds = array<i64: 1, 64>}, {pipeline_mode = #tpu.pipeline_mode<synchronous>, transform_indices = @transform_5, window_bounds = array<i64: 64, 128>}, {pipeline_mode = #tpu.pipeline_mode<synchronous>, transform_indices = @transform_6, window_bounds = array<i64: 1, 128>}, {pipeline_mode = #tpu.pipeline_mode<synchronous>, transform_indices = @transform_7, window_bounds = array<i64: 128, 1>}, {pipeline_mode = #tpu.pipeline_mode<synchronous>, transform_indices = @transform_8, window_bounds = array<i64: 1, 1>}, {transform_indices = @transform_9, window_bounds = array<i64: 8, 1>}]} {
    %c0 = arith.constant 0 : index
    %c0_0 = arith.constant 0 : index
    %0 = vector.load %arg1[%c0, %c0_0] : memref<8x2xf32, #tpu.memory_space<vmem>>, vector<8x2xf32>
    %1 = vector.extract_strided_slice %0 {offsets = [0, 0], sizes = [8, 1], strides = [1, 1]} : vector<8x2xf32> to vector<8x1xf32>
    %c0_1 = arith.constant 0 : index
    %c0_2 = arith.constant 0 : index
    %2 = vector.load %arg2[%c0_1, %c0_2] : memref<2x32xf32, #tpu.memory_space<vmem>>, vector<1x32xf32>
    %3 = vector.broadcast %1 : vector<8x1xf32> to vector<8x32xf32>
    %4 = vector.broadcast %2 : vector<1x32xf32> to vector<8x32xf32>
    %5 = arith.mulf %3, %4 : vector<8x32xf32>
    %6 = vector.extract_strided_slice %0 {offsets = [0, 1], sizes = [8, 1], strides = [1, 1]} : vector<8x2xf32> to vector<8x1xf32>
    %c1 = arith.constant 1 : index
    %c0_3 = arith.constant 0 : index
    %7 = vector.load %arg2[%c1, %c0_3] : memref<2x32xf32, #tpu.memory_space<vmem>>, vector<1x32xf32>
    %8 = vector.broadcast %6 : vector<8x1xf32> to vector<8x32xf32>
    %9 = vector.broadcast %7 : vector<1x32xf32> to vector<8x32xf32>
    %10 = arith.mulf %8, %9 : vector<8x32xf32>
    %11 = arith.addf %5, %10 : vector<8x32xf32>
    %c0_4 = arith.constant 0 : index
    %c0_5 = arith.constant 0 : index
    %12 = vector.load %arg3[%c0_4, %c0_5] : memref<1x32xf32, #tpu.memory_space<vmem>>, vector<1x32xf32>
    %13 = vector.broadcast %12 : vector<1x32xf32> to vector<8x32xf32>
    %14 = arith.addf %11, %13 : vector<8x32xf32>
    %cst = arith.constant 0.000000e+00 : f32
    %15 = vector.broadcast %cst : f32 to vector<8x32xf32>
    %16 = arith.maximumf %14, %15 : vector<8x32xf32>
    %c0_6 = arith.constant 0 : index
    %c0_7 = arith.constant 0 : index
    %17 = vector.load %arg4[%c0_6, %c0_7] : memref<32x64xf32, #tpu.memory_space<vmem>>, vector<32x64xf32>
    %cst_8 = arith.constant dense<0.000000e+00> : vector<8x64xf32>
    %18 = tpu.matmul %16, %17, %cst_8 {dimension_numbers = #tpu.dot_dimension_numbers<[1], [0], [0], [1], [0, 0, 1, 1], [], []>} : vector<8x32xf32>, vector<32x64xf32>, vector<8x64xf32> -> vector<8x64xf32>
    %c0_9 = arith.constant 0 : index
    %c0_10 = arith.constant 0 : index
    %19 = vector.load %arg5[%c0_9, %c0_10] : memref<1x64xf32, #tpu.memory_space<vmem>>, vector<1x64xf32>
    %20 = vector.broadcast %19 : vector<1x64xf32> to vector<8x64xf32>
    %21 = arith.addf %18, %20 : vector<8x64xf32>
    %cst_11 = arith.constant 0.000000e+00 : f32
    %22 = vector.broadcast %cst_11 : f32 to vector<8x64xf32>
    %23 = arith.maximumf %21, %22 : vector<8x64xf32>
    %c0_12 = arith.constant 0 : index
    %c0_13 = arith.constant 0 : index
    %24 = vector.load %arg6[%c0_12, %c0_13] : memref<64x128xf32, #tpu.memory_space<vmem>>, vector<64x128xf32>
    %cst_14 = arith.constant dense<0.000000e+00> : vector<8x128xf32>
    %25 = tpu.matmul %23, %24, %cst_14 {dimension_numbers = #tpu.dot_dimension_numbers<[1], [0], [0], [1], [0, 0, 1, 1], [], []>} : vector<8x64xf32>, vector<64x128xf32>, vector<8x128xf32> -> vector<8x128xf32>
    %c0_15 = arith.constant 0 : index
    %c0_16 = arith.constant 0 : index
    %26 = vector.load %arg7[%c0_15, %c0_16] : memref<1x128xf32, #tpu.memory_space<vmem>>, vector<1x128xf32>
    %27 = vector.broadcast %26 : vector<1x128xf32> to vector<8x128xf32>
    %28 = arith.addf %25, %27 : vector<8x128xf32>
    %cst_17 = arith.constant 0.000000e+00 : f32
    %29 = vector.broadcast %cst_17 : f32 to vector<8x128xf32>
    %30 = arith.maximumf %28, %29 : vector<8x128xf32>
    %c0_18 = arith.constant 0 : index
    %c0_19 = arith.constant 0 : index
    %31 = vector.load %arg8[%c0_18, %c0_19] : memref<128x1xf32, #tpu.memory_space<vmem>>, vector<128x1xf32>
    %cst_20 = arith.constant dense<0.000000e+00> : vector<8x1xf32>
    %32 = tpu.matmul %30, %31, %cst_20 {dimension_numbers = #tpu.dot_dimension_numbers<[1], [0], [0], [1], [0, 0, 1, 1], [], []>} : vector<8x128xf32>, vector<128x1xf32>, vector<8x1xf32> -> vector<8x1xf32>
    %c0_21 = arith.constant 0 : index
    %c0_22 = arith.constant 0 : index
    %33 = vector.load %arg9[%c0_21, %c0_22] : memref<1x1xf32, #tpu.memory_space<vmem>>, vector<1x1xf32>
    %34 = vector.broadcast %33 : vector<1x1xf32> to vector<8x1xf32>
    %35 = arith.addf %32, %34 : vector<8x1xf32>
    %c0_23 = arith.constant 0 : index
    %c0_24 = arith.constant 0 : index
    %36 = vector.load %arg10[%c0_23, %c0_24] : memref<8x1xf32, #tpu.memory_space<vmem>>, vector<8x1xf32>
    tpu.vector_store %arg10[%c0_23, %c0_24], %35 {strides = array<i32>} : memref<8x1xf32, #tpu.memory_space<vmem>>, vector<8x1xf32>,
    return
  }
  func.func @transform_0(%arg0: i32) -> (i32, i32) {
    %c0_i32 = arith.constant 0 : i32
    %c0_i32_0 = arith.constant 0 : i32
    return %arg0, %c0_i32 : i32, i32
  }
  func.func @transform_1(%arg0: i32) -> (i32, i32) {
    %c0_i32 = arith.constant 0 : i32
    %c0_i32_0 = arith.constant 0 : i32
    %c0_i32_1 = arith.constant 0 : i32
    return %c0_i32, %c0_i32_0 : i32, i32
  }
  func.func @transform_2(%arg0: i32) -> (i32, i32) {
    %c0_i32 = arith.constant 0 : i32
    %c0_i32_0 = arith.constant 0 : i32
    %c0_i32_1 = arith.constant 0 : i32
    return %c0_i32, %c0_i32_0 : i32, i32
  }
  func.func @transform_3(%arg0: i32) -> (i32, i32) {
    %c0_i32 = arith.constant 0 : i32
    %c0_i32_0 = arith.constant 0 : i32
    %c0_i32_1 = arith.constant 0 : i32
    return %c0_i32, %c0_i32_0 : i32, i32
  }
  func.func @transform_4(%arg0: i32) -> (i32, i32) {
    %c0_i32 = arith.constant 0 : i32
    %c0_i32_0 = arith.constant 0 : i32
    %c0_i32_1 = arith.constant 0 : i32
    return %c0_i32, %c0_i32_0 : i32, i32
  }
  func.func @transform_5(%arg0: i32) -> (i32, i32) {
    %c0_i32 = arith.constant 0 : i32
    %c0_i32_0 = arith.constant 0 : i32
    %c0_i32_1 = arith.constant 0 : i32
    return %c0_i32, %c0_i32_0 : i32, i32
  }
  func.func @transform_6(%arg0: i32) -> (i32, i32) {
    %c0_i32 = arith.constant 0 : i32
    %c0_i32_0 = arith.constant 0 : i32
    %c0_i32_1 = arith.constant 0 : i32
    return %c0_i32, %c0_i32_0 : i32, i32
  }
  func.func @transform_7(%arg0: i32) -> (i32, i32) {
    %c0_i32 = arith.constant 0 : i32
    %c0_i32_0 = arith.constant 0 : i32
    %c0_i32_1 = arith.constant 0 : i32
    return %c0_i32, %c0_i32_0 : i32, i32
  }
  func.func @transform_8(%arg0: i32) -> (i32, i32) {
    %c0_i32 = arith.constant 0 : i32
    %c0_i32_0 = arith.constant 0 : i32
    %c0_i32_1 = arith.constant 0 : i32
    return %c0_i32, %c0_i32_0 : i32, i32
  }
  func.func @transform_9(%arg0: i32) -> (i32, i32) {
    %c0_i32 = arith.constant 0 : i32
    %c0_i32_0 = arith.constant 0 : i32
    return %arg0, %c0_i32 : i32, i32
  }
}

</mosaic_0001>

<bundles_post_ra>
// kernel: tpu_custom_call.1
= control target key start
LH: loop header
LB: loop body
LE: loop exit
PB: predicated region body
PF: predicated region fallthrough
CT: control target
= control target key end

     0   :  { %s922_s11 = smov 0   ;;  %s1062_s0 = inlined_call_operand.vmem [shape: f32[16,2], index: 0, kind: input, shape index: {}]   ;;  %s1063_s1 = inlined_call_operand.vmem [shape: f32[2,32], index: 1, kind: input, shape index: {}]   ;;  %s1064_s2 = inlined_call_operand.vmem [shape: f32[1,32], index: 2, kind: input, shape index: {}]   ;;  %s1065_s3 = inlined_call_operand.vmem [shape: f32[32,64], index: 3, kind: input, shape index: {}]   ;;  %s1066_s4 = inlined_call_operand.vmem [shape: f32[1,64], index: 4, kind: input, shape index: {}]   ;;  %s1067_s5 = inlined_call_operand.vmem [shape: f32[64,128], index: 5, kind: input, shape index: {}]   ;;  %s1068_s6 = inlined_call_operand.vmem [shape: f32[1,128], index: 6, kind: input, shape index: {}]   ;;  %s1069_s7 = inlined_call_operand.vmem [shape: f32[128,1], index: 7, kind: input, shape index: {}]   ;;  %s1070_s8 = inlined_call_operand.<no memory space> [shape: f32[1,1], index: 8, kind: input, shape index: {}]   ;;  %s1071_s9 = inlined_call_operand.vmem [shape: f32[16,1], index: 9, kind: output, shape index: {}]  }
   0x1   :  { %v14_v0 = vstv %s1070_s8 }
   0x2   :  { %15 = vst [vmem:[#allocation2] sm:$0x1] %v14_v0 }
   0x3 LB: > { %s686_s12 = sadd.s32 4294967295, %s862_s11   ;;  %p690_p0 = scmp.ge.s32.totalorder %s862_s11, 1  ;;  %s862_s11 = sphi %s922_s11, %s21_s11  }
   0x4   : > { %p288_p1 = scmp.lt.s32.totalorder %s862_s11, 3 }
   0x6   : > { %p289_p2 = pnand %p690_p0, %p288_p1 }
   0x7   : > { %p322_p3 = scmp.lt.s32.totalorder (!%p289_p2), %s686_s12, 1  ;;  %v864_v1 = vmov (!%p289_p2), 0   ;;  %v362_v3 = vld [vmem:[%s1065_s3] sm:$0xff] (!%p289_p2)  ;;  %v363_v4 = vld [vmem:[%s1065_s3 + $0x8] sm:$0xff] (!%p289_p2)  ;;  %v865_v5 = vmov (!%p289_p2), 1   ;;  %v866_v7 = vmov (!%p289_p2), 0.0|0.0  }
   0x8   : > { %292 = sbr.rel (%p289_p2) target bundleno = 807 (0x327), region = 56  ;;  %854 = vset.pattern.permute.xlu0 (!%p289_p2), %v864_v1  ;;  %v800_v6 = vpack.c.bf16 (!%p289_p2), %v363_v4, %v362_v3  ;;  %799 = vmatprep.subr.bf16.mxu1 (!%p289_p2), %v866_v7  ;;  %v364_v8 = vld [vmem:[%s1065_s3 + $0x10] sm:$0xff] (!%p289_p2)  ;;  %v365_v9 = vld [vmem:[%s1065_s3 + $0x18] sm:$0xff] (!%p289_p2)  ;;  %vm867_vm0 = vmmov (!%p289_p2), 0   ;;  %v868_v11 = vmov (!%p289_p2), 0.0   ;;  %v448_v20 = vld [vmem:[%s1067_s5] sm:$0xff] (!%p289_p2) }
   0x9   : > { %817 = vmatprep.subr.bf16.mxu0 (!%p289_p2), %v866_v7  ;;  %v803_v10 = vpack.c.bf16 (!%p289_p2), %v365_v9, %v364_v8  ;;  %742 = vmatprep.mubr.msk.f32.mxu1 (!%p289_p2), %vm867_vm0, %v868_v11  ;;  %v693_v13 = vld [vmem:[%s1063_s1] ss:$0 sm:$0xff] (!%p289_p2)  ;;  %v694_v14 = vld [vmem:[%s1063_s1 + $0x1] ss:$0 sm:$0xff] (!%p289_p2)  ;;  %v449_v21 = vld [vmem:[%s1067_s5 + $0x8] sm:$0xff] (!%p289_p2)  ;;  %vm373_vm1 = vcmask (!%p289_p2), 261120  }
   0xa   : > { %801 = vmatpush3.bf16.msra.mxu1 (!%p289_p2), %v800_v6  ;;  %796 = vmatprep.mubr.msk.f32.mxu0 (!%p289_p2), %vm867_vm0, %v868_v11  ;;  %v695_v18 = vld [vmem:[%s1064_s2] ss:$0 sm:$0xff] (!%p289_p2)  ;;  %v806_v23 = vpack.c.bf16 (!%p289_p2), %v449_v21, %v448_v20  ;;  %v450_v25 = vld [vmem:[%s1067_s5 + $0x10] sm:$0xff] (!%p289_p2)  ;;  %v451_v26 = vld [vmem:[%s1067_s5 + $0x18] sm:$0xff] (!%p289_p2)  ;;  %vm463_vm2 = vcmask (!%p289_p2), 523264   ;;  %vm631_vm3 = vcmask (!%p289_p2), 7168  }
   0xb   : > { %802 = vmatprep.subr.bf16.mxu1 (!%p289_p2), %v866_v7  ;;  %v809_v27 = vpack.c.bf16 (!%p289_p2), %v451_v26, %v450_v25  ;;  %v452_v28 = vld [vmem:[%s1067_s5 + $0x20] sm:$0xff] (!%p289_p2)  ;;  %v453_v29 = vld [vmem:[%s1067_s5 + $0x28] sm:$0xff] (!%p289_p2)  ;;  %v454_v31 = vld [vmem:[%s1067_s5 + $0x30] sm:$0xff] (!%p289_p2) }
   0xc   : > { %v812_v30 = vpack.c.bf16 (!%p289_p2), %v453_v29, %v452_v28  ;;  %v455_v32 = vld [vmem:[%s1067_s5 + $0x38] sm:$0xff] (!%p289_p2)  ;;  %v538_v34 = vld [vmem:[%s1069_s7] sm:$0xff] (!%p289_p2)  ;;  %v539_v35 = vld [vmem:[%s1069_s7 + $0x8] sm:$0xff] (!%p289_p2) }
   0xd   : > { %v815_v33 = vpack.c.bf16 (!%p289_p2), %v455_v32, %v454_v31  ;;  %v540_v36 = vld [vmem:[%s1069_s7 + $0x10] sm:$0xff] (!%p289_p2)  ;;  %v818_v37 = vpack.c.bf16 (!%p289_p2), %v539_v35, %v538_v34  ;;  %v541_v38 = vld [vmem:[%s1069_s7 + $0x18] sm:$0xff] (!%p289_p2)  ;;  %v542_v40 = vld [vmem:[%s1069_s7 + $0x20] sm:$0xff] (!%p289_p2) }
   0xe   : > { %804 = vmatpush3.bf16.msra.mxu1 (!%p289_p2), %v803_v10  ;;  %v821_v39 = vpack.c.bf16 (!%p289_p2), %v541_v38, %v540_v36  ;;  %v543_v41 = vld [vmem:[%s1069_s7 + $0x28] sm:$0xff] (!%p289_p2)  ;;  %v544_v43 = vld [vmem:[%s1069_s7 + $0x30] sm:$0xff] (!%p289_p2)  ;;  %v545_v44 = vld [vmem:[%s1069_s7 + $0x38] sm:$0xff] (!%p289_p2) }
   0xf   : > { %s1073_s12 = smov (!%p322_p3, %s686_s12), 1  ;;  %805 = vmatprep.subr.bf16.mxu1 %v866_v7  ;;  %819 = vmatpush3.bf16.msra.mxu0 %v818_v37  ;;  %v824_v42 = vpack.c.bf16 %v543_v41, %v542_v40  ;;  %v827_v45 = vpack.c.bf16 %v545_v44, %v544_v43  ;;  %v546_v46 = vld [vmem:[%s1069_s7 + $0x40] sm:$0xff]  ;;  %v547_v47 = vld [vmem:[%s1069_s7 + $0x48] sm:$0xff]  ;;  %v548_v49 = vld [vmem:[%s1069_s7 + $0x50] sm:$0xff] }
  0x10   : > { %s691_s8 = sshll.u32 %s1073_s12, 3  ;;  %820 = vmatprep.subr.bf16.mxu0 %v866_v7  ;;  %v830_v48 = vpack.c.bf16 %v547_v47, %v546_v46  ;;  %v549_v50 = vld [vmem:[%s1069_s7 + $0x58] sm:$0xff]  ;;  %v550_v52 = vld [vmem:[%s1069_s7 + $0x60] sm:$0xff]  ;;  %v551_v53 = vld [vmem:[%s1069_s7 + $0x68] sm:$0xff] }
  0x11   : > { %s325_s15 = scalar_lea.vmem %s1062_s0, %s691_s8  ;;  %v833_v51 = vpack.c.bf16 %v549_v50, %v548_v49  ;;  %v836_v54 = vpack.c.bf16 %v551_v53, %v550_v52  ;;  %v696_v55 = vld [vmem:[%s1066_s4] ss:$0 sm:$0xff]  ;;  %v552_v60 = vld [vmem:[%s1069_s7 + $0x70] sm:$0xff]  ;;  %v553_v61 = vld [vmem:[%s1069_s7 + $0x78] sm:$0xff]  ;;  %s329_s27 = scalar_lea.vmem %s1071_s9, %s691_s8 }
  0x12   : > { %v330_v2 = vld [vmem:[%s325_s15] sm:$0xff]  ;;  %v839_v62 = vpack.c.bf16 %v553_v61, %v552_v60 }
  0x13   : > { %334 = vperm.xlu0 %854, %v330_v2   ;;  %822 = vmatpush3.bf16.msra.mxu0 %v821_v39  ;;  %v698_v63 = vld [vmem:[%s1068_s6] ss:$0 sm:$0xff] }
  0x14   : > { %823 = vmatprep.subr.bf16.mxu0 %v866_v7  ;;  %v700_v4 = vld [vmem:[#allocation2] ss:$0 sm:$0xff] }
  0x17   : > { %855 = vset.pattern.permute.xlu0 %v865_v5  ;;  %825 = vmatpush3.bf16.msra.mxu0 %v824_v42 }
  0x18   : > { %344 = vperm.xlu0 %855, %v330_v2   ;;  %826 = vmatprep.subr.bf16.mxu0 %v866_v7 }
  0x1b   : > { %828 = vmatpush3.bf16.msra.mxu0 %v827_v45 }
  0x1c   : > { %829 = vmatprep.subr.bf16.mxu0 %v866_v7 }
  0x1f   : > { %831 = vmatpush3.bf16.msra.mxu0 %v830_v48 }
  0x20   : > { %832 = vmatprep.subr.bf16.mxu0 %v866_v7 }
  0x23   : > { %834 = vmatpush3.bf16.msra.mxu0 %v833_v51 }
  0x24   : > { %835 = vmatprep.subr.bf16.mxu0 %v866_v7 }
  0x27   : > { %837 = vmatpush3.bf16.msra.mxu0 %v836_v54 }
  0x28   : > { %838 = vmatprep.subr.bf16.mxu0 %v866_v7 }
  0x2b   : > { %840 = vmatpush3.bf16.msra.mxu0 %v839_v62 }
  0x92   : > { %v335_v12 = vpop.permute.xlu0 %334 }
  0x93   : > { %v341_v16 = vmul.f32 %v693_v13, %v335_v12 }
  0x97   : > { %v345_v15 = vpop.permute.xlu0 %344 }
  0x98   : > { %v351_v17 = vmul.f32 %v694_v14, %v345_v15 }
  0x9a   : > { %v352_v19 = vadd.f32 %v351_v17, %v341_v16 }
  0x9c   : > { %v360_v22 = vadd.f32 %v695_v18, %v352_v19 }
  0x9e   : > { %v361_v24 = vmax.f32 %v360_v22, 0.0 }
  0xa0   : > { %743 = vmatmul.mubr.msk.f32.vlgmr.msra.gmra.mrb[0].mxu1 %vm373_vm1, %v361_v24 }
  0xa1   : > { %807 = vmatpush3.bf16.msra.mxu1 %v806_v23  ;;  %761 = vmatprep.mubr.msk.f32.mxu1 %vm867_vm0, %v868_v11 }
  0xa2   : > { %808 = vmatprep.subr.bf16.mxu1 %v866_v7 }
  0xa5   : > { %810 = vmatpush3.bf16.msra.mxu1 %v809_v27 }
  0xa6   : > { %811 = vmatprep.subr.bf16.mxu1 %v866_v7 }
  0xa9   : > { %813 = vmatpush3.bf16.msra.mxu1 %v812_v30 }
  0xaa   : > { %814 = vmatprep.subr.bf16.mxu1 %v866_v7 }
  0xad   : > { %816 = vmatpush3.bf16.msra.mxu1 %v815_v33 }
 0x173   : > { %v443_v56 = vpop.f32.mrb[0].mxu1 }
 0x174   : > { %v444_v57 = vadd.f32 %v696_v55, %v443_v56  ;;  %v744_v58 = vpop.f32.mrb[1].mxu1 }
 0x176   : > { %v447_v59 = vmax.f32 %v444_v57, 0.0 }
 0x178   : > { %762 = vmatmul.mubr.msk.f32.vlgmr.msra.gmra.mrb[2].mxu1 %vm463_vm2, %v447_v59 }
 0x24b   : > { %v533_v0 = vpop.f32.mrb[2].mxu1 }
 0x24c   : > { %v534_v1 = vadd.f32 %v698_v63, %v533_v0  ;;  %v763_v2 = vpop.f32.mrb[3].mxu1 }
 0x24e   : > { %v537_v3 = vmax.f32 %v534_v1, 0.0 }
 0x250   : > { %797 = vmatmul.mubr.f32.vlgmr.msra.gmra.mrb[0].mxu0 %v537_v3 }
 0x323   : > { %v627_v5 = vpop.f32.mrb[0].mxu0 }
 0x324   : > { %v628_v6 = vadd.f32 %v700_v4, %v627_v5  ;;  %v798_v7 = vpop.f32.mrb[1].mxu0 }
 0x326   : > { %632 = vst.msk [vmem:[%s329_s27] sm:$0xff] %vm631_vm3, %v628_v6 }
 0x327 PF: > { %s21_s11 = sadd.s32 1, %s862_s11  }
 0x328   : > { %p18_p4 = scmp.ge.s32.totalorder %s21_s11, 4  }
 0x32a   :  { %20 = sbr.rel (!%p18_p4) target bundleno = 3 (0x3), region = 86 }

</bundles_post_ra>
